<compile_context>
chip_gen: v6e
topology: v6e:2x2x1
jax: 0.10.0
libtpu: 0.0.40
codegen_flags: <defaults>
</compile_context>

<pallas_src>
import jax
import jax.numpy as jnp
from jax.experimental import pallas as pl
from jax.experimental.pallas import tpu as pltpu


def _se_kernel(x_ref, w1_ref, w2_ref, o_ref):
    # x_ref: (bt, C, HW), w1_ref: (C, C//r), w2_ref: (C//r, C), o_ref: (bt, C, HW)
    x = x_ref[...]
    xf = x.astype(jnp.float32)

    # Squeeze: global average pool over the spatial (lane) axis, f32 accumulate.
    y = jnp.mean(xf, axis=-1)                                          # (bt, C)

    # Excitation: FC -> ReLU -> FC -> Sigmoid (bias-free Linears).  Tiny MXU
    # matmuls, negligible next to the HBM traffic of the scale pass.
    h = jnp.dot(y, w1_ref[...], preferred_element_type=jnp.float32)
    h = jnp.maximum(h, 0.0)                                            # (bt, C//r)
    s = jnp.dot(h, w2_ref[...], preferred_element_type=jnp.float32)
    s = jax.nn.sigmoid(s)                                              # (bt, C)

    # Scale: broadcast the per-channel gate over the spatial axis; lane-dense
    # store in the output dtype.
    o_ref[...] = (xf * s[:, :, None]).astype(o_ref.dtype)


def _pick_batch_tile(batch, per_sample_bytes, budget=4 << 20):
    """Largest divisor of `batch` whose block fits `budget`, keeping >= 2 grid
    steps so the DMA/compute pipeline (and v7x's second core) has work to
    overlap.  Falls back to bt=1 for tiny batches / huge samples."""
    if batch <= 1:
        return max(batch, 1)
    bt = 1
    for cand in range(2, batch + 1):
        if batch % cand:
            continue
        if cand * per_sample_bytes > budget:
            break
        if batch // cand < 2:
            break
        bt = cand
    return bt


def se_block(x, w1, w2):
    """x: (B, C, H, W); w1: (C, C//r); w2: (C//r, C). Returns (B, C, H, W)."""
    B, C, H, W = x.shape
    Cr = w1.shape[1]
    HW = H * W
    x_flat = x.reshape(B, C, HW)

    itemsize = jnp.dtype(x.dtype).itemsize
    per_sample_bytes = C * HW * itemsize
    bt = _pick_batch_tile(B, per_sample_bytes)

    # VMEM budget: in + out blocks, double-buffered, resident weights, slack.
    block_bytes = bt * per_sample_bytes
    weight_bytes = (C * Cr + Cr * C) * jnp.dtype(w1.dtype).itemsize
    needed = 4 * block_bytes + 2 * weight_bytes + (2 << 20)
    vmem_limit = int(min(max(needed, 16 << 20), 64 << 20))

    cost = pl.CostEstimate(
        flops=4 * B * C * Cr + 2 * B * C * HW,   # two FCs + pool adds + scale muls
        transcendentals=B * C,                   # sigmoid
        bytes_accessed=2 * B * C * HW * itemsize + weight_bytes,
    )

    out_flat = pl.pallas_call(
        _se_kernel,
        out_shape=jax.ShapeDtypeStruct((B, C, HW), x.dtype),
        grid=(B // bt,),
        in_specs=[
            pl.BlockSpec((bt, C, HW), lambda i: (i, 0, 0)),
            pl.BlockSpec((C, Cr), lambda i: (0, 0)),
            pl.BlockSpec((Cr, C), lambda i: (0, 0)),
        ],
        out_specs=pl.BlockSpec((bt, C, HW), lambda i: (i, 0, 0)),
        compiler_params=pltpu.CompilerParams(
            dimension_semantics=("parallel",),
            vmem_limit_bytes=vmem_limit,
        ),
        cost_estimate=cost,
    )(x_flat, w1, w2)

    return out_flat.reshape(B, C, H, W)


def init_params(key, channel, reduction=16):
    """Deterministic init mirroring nn.Linear default (uniform +/- 1/sqrt(fan_in))."""
    cr = channel // reduction
    k1, k2 = jax.random.split(key)
    bound1 = 1.0 / jnp.sqrt(channel)
    bound2 = 1.0 / jnp.sqrt(cr)
    # Stored transposed relative to PyTorch: (in_features, out_features).
    w1 = jax.random.uniform(k1, (channel, cr), jnp.float32, -bound1, bound1)
    w2 = jax.random.uniform(k2, (cr, channel), jnp.float32, -bound2, bound2)
    return w1, w2


def se_block_ref(x, w1, w2):
    """Pure-JAX reference for correctness check."""
    y = jnp.mean(x, axis=(2, 3))                       # (B, C)
    h = jnp.maximum(y @ w1, 0.0)
    s = jax.nn.sigmoid(h @ w2)
    return x * s[:, :, None, None]


if __name__ == "__main__":
    # Small shapes consistent with the module (reduction=16 needs C >= 16).
    B, C, H, W = 2, 64, 16, 16
    reduction = 16

    key = jax.random.PRNGKey(0)
    kx, kp = jax.random.split(key)
    x = jax.random.normal(kx, (B, C, H, W), dtype=jnp.float32)
    w1, w2 = init_params(kp, C, reduction)

    out = se_block(x, w1, w2)
    out = jax.block_until_ready(out)

    ref = se_block_ref(x, w1, w2)
    assert out.shape == (B, C, H, W)
    assert jnp.allclose(out, ref, atol=1e-5, rtol=1e-5), "mismatch vs reference"

    print("KERNEL_OK")
</pallas_src>

<mosaic_0001>
module attributes {stable_mosaic.version = 11 : i64} {
  func.func @_se_kernel(%arg0: i32, %arg1: memref<1x64x256xf32, #tpu.memory_space<vmem>>, %arg2: memref<64x4xf32, #tpu.memory_space<vmem>>, %arg3: memref<4x64xf32, #tpu.memory_space<vmem>>, %arg4: memref<1x64x256xf32, #tpu.memory_space<vmem>>) attributes {dimension_semantics = [#tpu.dimension_semantics<parallel>], iteration_bounds = array<i64: 2>, scalar_prefetch = 0 : i64, scratch_operands = 0 : i64, tpu.core_type = #tpu.core_type<tc>, window_params = [{transform_indices = @transform_0, window_bounds = array<i64: 1, 64, 256>}, {pipeline_mode = #tpu.pipeline_mode<synchronous>, transform_indices = @transform_1, window_bounds = array<i64: 64, 4>}, {pipeline_mode = #tpu.pipeline_mode<synchronous>, transform_indices = @transform_2, window_bounds = array<i64: 4, 64>}, {transform_indices = @transform_3, window_bounds = array<i64: 1, 64, 256>}]} {
    %c0 = arith.constant 0 : index
    %c0_0 = arith.constant 0 : index
    %c0_1 = arith.constant 0 : index
    %0 = vector.load %arg1[%c0, %c0_0, %c0_1] : memref<1x64x256xf32, #tpu.memory_space<vmem>>, vector<1x64x256xf32>
    %cst = arith.constant dense<0.000000e+00> : vector<1x64xf32>
    %1 = vector.multi_reduction <add>, %0, %cst [2] : vector<1x64x256xf32> to vector<1x64xf32>
    %cst_2 = arith.constant 2.560000e+02 : f32
    %2 = vector.broadcast %cst_2 : f32 to vector<1x64xf32>
    %3 = arith.divf %1, %2 : vector<1x64xf32>
    %c0_3 = arith.constant 0 : index
    %c0_4 = arith.constant 0 : index
    %4 = vector.load %arg2[%c0_3, %c0_4] : memref<64x4xf32, #tpu.memory_space<vmem>>, vector<64x4xf32>
    %cst_5 = arith.constant dense<0.000000e+00> : vector<1x4xf32>
    %5 = tpu.matmul %3, %4, %cst_5 {dimension_numbers = #tpu.dot_dimension_numbers<[1], [0], [0], [1], [0, 0, 1, 1], [], []>} : vector<1x64xf32>, vector<64x4xf32>, vector<1x4xf32> -> vector<1x4xf32>
    %cst_6 = arith.constant 0.000000e+00 : f32
    %6 = vector.broadcast %cst_6 : f32 to vector<1x4xf32>
    %7 = arith.maximumf %5, %6 : vector<1x4xf32>
    %c0_7 = arith.constant 0 : index
    %c0_8 = arith.constant 0 : index
    %8 = vector.load %arg3[%c0_7, %c0_8] : memref<4x64xf32, #tpu.memory_space<vmem>>, vector<4x64xf32>
    %cst_9 = arith.constant dense<0.000000e+00> : vector<1x64xf32>
    %9 = tpu.matmul %7, %8, %cst_9 {dimension_numbers = #tpu.dot_dimension_numbers<[1], [0], [0], [1], [0, 0, 1, 1], [], []>} : vector<1x4xf32>, vector<4x64xf32>, vector<1x64xf32> -> vector<1x64xf32>
    %10 = arith.negf %9 : vector<1x64xf32>
    %11 = math.exp %10 : vector<1x64xf32>
    %cst_10 = arith.constant 1.000000e+00 : f32
    %12 = vector.broadcast %cst_10 : f32 to vector<1x64xf32>
    %13 = arith.addf %12, %11 : vector<1x64xf32>
    %14 = arith.divf %12, %13 : vector<1x64xf32>
    %15 = vector.shape_cast %14 : vector<1x64xf32> to vector<1x64x1xf32>
    %16 = vector.broadcast %15 : vector<1x64x1xf32> to vector<1x64x256xf32>
    %17 = arith.mulf %0, %16 : vector<1x64x256xf32>
    %c0_11 = arith.constant 0 : index
    %c0_12 = arith.constant 0 : index
    %c0_13 = arith.constant 0 : index
    %18 = vector.load %arg4[%c0_11, %c0_12, %c0_13] : memref<1x64x256xf32, #tpu.memory_space<vmem>>, vector<1x64x256xf32>
    tpu.vector_store %arg4[%c0_11, %c0_12, %c0_13], %17 {strides = array<i32>} : memref<1x64x256xf32, #tpu.memory_space<vmem>>, vector<1x64x256xf32>,
    return
  }
  func.func @transform_0(%arg0: i32) -> (i32, i32, i32) {
    %c0_i32 = arith.constant 0 : i32
    %c0_i32_0 = arith.constant 0 : i32
    %c0_i32_1 = arith.constant 0 : i32
    return %arg0, %c0_i32, %c0_i32_0 : i32, i32, i32
  }
  func.func @transform_1(%arg0: i32) -> (i32, i32) {
    %c0_i32 = arith.constant 0 : i32
    %c0_i32_0 = arith.constant 0 : i32
    %c0_i32_1 = arith.constant 0 : i32
    return %c0_i32, %c0_i32_0 : i32, i32
  }
  func.func @transform_2(%arg0: i32) -> (i32, i32) {
    %c0_i32 = arith.constant 0 : i32
    %c0_i32_0 = arith.constant 0 : i32
    %c0_i32_1 = arith.constant 0 : i32
    return %c0_i32, %c0_i32_0 : i32, i32
  }
  func.func @transform_3(%arg0: i32) -> (i32, i32, i32) {
    %c0_i32 = arith.constant 0 : i32
    %c0_i32_0 = arith.constant 0 : i32
    %c0_i32_1 = arith.constant 0 : i32
    return %arg0, %c0_i32, %c0_i32_0 : i32, i32, i32
  }
}

</mosaic_0001>

<bundles_post_ra>
// kernel: tpu_custom_call.1
= control target key start
LH: loop header
LB: loop body
LE: loop exit
PB: predicated region body
PF: predicated region fallthrough
CT: control target
= control target key end

     0   :  { %8 = vsyncpa [#allocation3], 0  ;;  %s1135_s0 = inlined_call_operand.hbm [shape: f32[2,64,256], index: 0, kind: input, shape index: {}]   ;;  %s1136_s1 = inlined_call_operand.vmem [shape: f32[64,4], index: 1, kind: input, shape index: {}]   ;;  %s1137_s2 = inlined_call_operand.vmem [shape: f32[4,64], index: 2, kind: input, shape index: {}]   ;;  %s1138_s3 = inlined_call_operand.hbm [shape: f32[2,64,256], index: 3, kind: output, shape index: {}]  }
   0x1   :  { %10 = vsyncpa [#allocation3 + $0x1], 0 }
   0x2   :  { %11 = vsyncpa [#allocation4], 0 }
   0x3   :  { %13 = vsyncpa [#allocation4 + $0x1], 0  ;;  %s855_s12 = smov 0   ;;  %s857_s13 = smov 0  }
   0x4   :  { %s859_s14 = smov 0   ;;  %s861_s15 = smov 0  }
   0x5 LB: > { %s876_s16 = sadd.s32 4294967295, %s825_s15   ;;  %s622_s17 = sadd.s32 4294967294, %s825_s15   ;;  %s825_s15 = sphi %s861_s15, %s1153_s15   ;;  %s821_s14 = sphi %s859_s14, %s1152_s14   ;;  %s817_s13 = sphi %s857_s13, %s1151_s13   ;;  %s813_s12 = sphi %s855_s12, %s1150_s12  }
   0x6   : > { %s880_s18 = sadd.s32 1, %s825_s15   ;;  %s26_s19 = sadd.s32 1, %s821_s14 }
   0x7   : > { %s23_s20 = ssub.s32 %s825_s15, %s880_s18  ;;  %p33_p0 = scmp.ne.s32.totalorder %s821_s14, %s817_s13 }
   0x8   : > { %p24_p1 = scmp.eq.s32.totalorder %s23_s20, 0  ;;  %p34_p2 = scmp.eq.s32.totalorder %s825_s15, 0 }
   0x9   : > { %p39_p3 = scmp.ne.s32.totalorder %s817_s13, %s813_s12  ;;  %p40_p4 = scmp.eq.s32.totalorder %s876_s16, 0 }
   0xa   : > { %s892_s21 = scalar_select %p24_p1, %s821_s14, %s26_s19  }
   0xb   : > { %p894_p5 = por %p34_p2, %p33_p0  ;;  %p898_p6 = por %p40_p4, %p39_p3 }
   0xc   : > { %p105_p7 = scmp.eq.s32.totalorder %s876_s16, 1  ;;  %p111_p8 = scmp.eq.s32.totalorder %s622_s17, 1 }
   0xd   : > { %s1142_s23 = scalar_select %p898_p6, 1, 0 }
   0xe   : > { %p689_p10 = scmp.lt.s32.totalorder %s825_s15, 2  ;;  %p905_p11 = por %p105_p7, %p33_p0 }
   0xf   : > { %p909_p12 = por %p111_p8, %p39_p3  ;;  %s137_s26 = sand.u32 1, %s821_s14  }
  0x10   : > { %s1143_s24 = scalar_select %p905_p11, 1, 0 }
  0x11   : > { %s1144_s25 = scalar_select %p909_p12, 1, 0 }
  0x12   : > { %s640_s27 = sshll.u32 %s825_s15, 11  ;;  %s625_s28 = sshll.u32 %s137_s26, 7 }
  0x13   : > { %s918_s4 = scalar_lea.hbm %s1135_s0, %s640_s27  ;;  %s141_s5 = scalar_lea.vmem [#allocation2], %s625_s28 }
  0x14   : > { %s148_s6 = sshll.u32 %s141_s5, 4  ;;  %p922_p13 = pnand %p689_p10, %p894_p5  ;;  %s926_s6 = int_to_ptr.vmem [resolvable:$true] %s148_s6 }
  0x15   : > { %s928_s8 = scalar_lea.sflag [#allocation3], %s137_s26  ;;  %s733_s9 = scalar_lea.hbm %s918_s4, 2048 }
  0x16   : > { %p734_p0 = scmp.ne.s32.totalorder %s918_s4, %s733_s9  ;;  %p735_p1 = pneg %p922_p13 }
  0x17   : > { %s738_s17 = scalar_lea.hbm %s1135_s0, 4096  ;;  %p739_p4 = scmp.lt.s32.totalorder %s918_s4, %s1135_s0 }
  0x18   : > { %p736_p2 = pnand %p735_p1, %p734_p0  ;;  %p740_p5 = scmp.lt.s32.totalorder %s738_s17, %s733_s9 }
  0x1a   : > { %p737_p3 = pneg %p736_p2  ;;  %p741_p7 = por %p740_p5, %p739_p4 }
  0x1c   : > { %p742_p8 = pnand %p741_p7, %p737_p3 }
  0x1e   : > { %745 = shalt.err (!%p742_p8)
}
  0x1f   : > { %s746_s22 = scalar_lea.vmem %s926_s6, 2048  ;;  %s827_s26 = smov [#allocation2]  }
  0x20   : > { %p747_p10 = scmp.ne.s32.totalorder %s926_s6, %s746_s22  ;;  %s751_s27 = sshll.u32 %s827_s26, 4  ;;  %s752_s27 = int_to_ptr.vmem [resolvable:$false] %s751_s27 }
  0x21   : > { %s753_s28 = scalar_lea.vmem %s752_s27, 4096  ;;  %p754_p2 = scmp.lt.s32.totalorder %s926_s6, %s752_s27 }
  0x22   : > { %p749_p9 = pnand %p747_p10, %p735_p1  ;;  %p755_p12 = scmp.lt.s32.totalorder %s753_s28, %s746_s22 }
  0x24   : > { %p750_p0 = pneg %p749_p9  ;;  %p756_p11 = por %p755_p12, %p754_p2 }
  0x26   : > { %p757_p6 = pnand %p756_p11, %p750_p0 }
  0x28   : > { %760 = shalt.err (!%p757_p6)
}
  0x29   : > { %s828_s29 = smov 256   ;;  %s829_s30 = smov 16  }
  0x2a   : > { %684 = dma.hbm_to_vmem [thread:$0]  (!%p922_p13), %s918_s4, 2048, %s926_s6, %s928_s8, %s828_s29, %s828_s29, %s829_s30  }
  0x2b   : > { %p628_p9 = scmp.ge.s32.totalorder %s825_s15, 1  ;;  %p156_p1 = scmp.lt.s32.totalorder %s825_s15, 3 }
  0x2d   : > { %p157_p3 = pnand %p628_p9, %p156_p1 }
  0x2e   : > { %s952_s5 = sand.u32 (!%p157_p3), 1, %s817_s13   ;;  %p1146_p6 = scmp.ne.s32.totalorder (!%p157_p3), %s1142_s23, 0 }
  0x2f   : > { %160 = sbr.rel (%p157_p3) target bundleno = 781 (0x30d), region = 32  ;;  %s629_s9 = sshll.u32 (!%p157_p3), %s952_s5, 7 }
  0x30   : > { %s163_s10 = scalar_lea.sflag (!%p157_p3), [#allocation3], %s952_s5  ;;  %s166_s11 = scalar_lea.vmem (!%p157_p3), [#allocation2], %s629_s9 }
  0x34   : > { %804 = dma.done.wait (%p1146_p6), %s163_s10, 2048  }
  0x35   : > { %806 = vsyncadd (%p1146_p6), %s163_s10, 4294965248  ;;  %v962_v0 = vld [vmem:[%s166_s11] sm:$0xff]  ;;  %v964_v1 = vld [vmem:[%s166_s11 + $0x8] sm:$0xff]  ;;  %v830_v24 = vmov 0.0   ;;  %vm831_vm0 = vmmov 0   ;;  %v254_v33 = vlaneseq  ;;  %vm265_vm1 = vcmask 130112  }
  0x36   : > { %v966_v2 = vld [vmem:[%s166_s11 + $0x20] sm:$0xff]  ;;  %v205_v3 = vadd.f32 %v964_v1, %v962_v0  ;;  %v970_v4 = vld [vmem:[%s166_s11 + $0x28] sm:$0xff]  ;;  %v972_v5 = vld [vmem:[%s166_s11 + $0x10] sm:$0xff]  ;;  %653 = vmatprep.subr.mxu0 %v830_v24  ;;  %672 = vmatprep.subr.mxu1 %v830_v24  ;;  %vm272_vm2 = vcmask 195712   ;;  %vm279_vm3 = vcmask 261312   ;;  %vm286_vm4 = vcmask 326912  }
  0x37   : > { %v974_v6 = vld [vmem:[%s166_s11 + $0x18] sm:$0xff]  ;;  %v211_v7 = vadd.f32 %v970_v4, %v966_v2  ;;  %v978_v8 = vld [vmem:[%s166_s11 + $0x30] sm:$0xff]  ;;  %v986_v12 = vld [vmem:[%s166_s11 + $0x40] sm:$0xff]  ;;  %669 = vmatprep.mubr.msk.f32.mxu0 %vm831_vm0, %v830_v24  ;;  %674 = vmatprep.mubr.msk.f32.mxu1 %vm831_vm0, %v830_v24  ;;  %v255_v34 = vand.u32 127, %v254_v33  ;;  %v1034_v35 = vshrl.u32 %v254_v33, 7  ;;  %vm293_vm5 = vcmask 392512  }
  0x38   : > { %v980_v9 = vld [vmem:[%s166_s11 + $0x38] sm:$0xff]  ;;  %206 = vadd.xlane.f32.xlu0 %v205_v3  ;;  %v208_v10 = vadd.f32 %v974_v6, %v972_v5  ;;  %v988_v13 = vld [vmem:[%s166_s11 + $0x48] sm:$0xff]  ;;  %v990_v14 = vld [vmem:[%s166_s11 + $0x50] sm:$0xff]  ;;  %vm300_vm6 = vcmask 458112   ;;  %vm307_vm7 = vcmask 523712   ;;  %vm309_vm8 = vcmask 523264  }
  0x39   : > { %212 = vadd.xlane.f32.xlu1 %v211_v7  ;;  %v214_v11 = vadd.f32 %v980_v9, %v978_v8  ;;  %v992_v15 = vld [vmem:[%s166_s11 + $0x58] sm:$0xff]  ;;  %v217_v16 = vadd.f32 %v988_v13, %v986_v12  ;;  %v998_v18 = vld [vmem:[%s166_s11 + $0x60] sm:$0xff]  ;;  %v1000_v19 = vld [vmem:[%s166_s11 + $0x68] sm:$0xff]  ;;  %v260_v36 = vadd.s32 4294967288, %v255_v34  ;;  %v267_v38 = vadd.s32 4294967280, %v255_v34  ;;  %s1055_s6 = scalar_lea.vmem [#allocation5], %s629_s9 }
  0x3a   : > { %v220_v17 = vadd.f32 %v992_v15, %v990_v14  ;;  %v1002_v20 = vld [vmem:[%s166_s11 + $0x70] sm:$0xff]  ;;  %v1004_v21 = vld [vmem:[%s166_s11 + $0x78] sm:$0xff]  ;;  %v223_v22 = vadd.f32 %v1000_v19, %v998_v18  ;;  %v243_v27 = vld [vmem:[%s1136_s1 + $0x28] sm:$0xff]  ;;  %v274_v39 = vadd.s32 4294967272, %v255_v34  ;;  %v258_v41 = vsub.s32 %v255_v34, %v1034_v35  ;;  %s641_s9 = sshll.u32 %s876_s16, 11  ;;  %s549_s7 = sshll.u32 %s1055_s6, 4  ;;  %s1088_s7 = int_to_ptr.vmem [resolvable:$true] %s549_s7 }
  0x3b   : > { %v226_v23 = vadd.f32 %v1004_v21, %v1002_v20  ;;  %v245_v25 = vld [vmem:[%s1136_s1 + $0x38] sm:$0xff]  ;;  %v244_v26 = vld [vmem:[%s1136_s1 + $0x30] sm:$0xff]  ;;  %v242_v28 = vld [vmem:[%s1136_s1 + $0x20] sm:$0xff]  ;;  %v263_v43 = vsub.s32 %v260_v36, %v1034_v35  ;;  %v281_v44 = vadd.s32 4294967264, %v255_v34  ;;  %v270_v45 = vsub.s32 %v267_v38, %v1034_v35  ;;  %s1086_s19 = scalar_lea.hbm %s1138_s3, %s641_s9  ;;  %s536_s16 = scalar_lea.sflag [#allocation4], %s952_s5 }
  0x3c   : > { %209 = vadd.xlane.f32.xlu0 %v208_v10  ;;  %654 = vmatpush3.msra.mxu0 %v245_v25  ;;  %v241_v29 = vld [vmem:[%s1136_s1 + $0x18] sm:$0xff]  ;;  %v240_v30 = vld [vmem:[%s1136_s1 + $0x10] sm:$0xff]  ;;  %v239_v31 = vld [vmem:[%s1136_s1 + $0x8] sm:$0xff]  ;;  %v277_v48 = vsub.s32 %v274_v39, %v1034_v35  ;;  %v288_v49 = vadd.s32 4294967256, %v255_v34  ;;  %v295_v56 = vadd.s32 4294967248, %v255_v34  ;;  %v302_v61 = vadd.s32 4294967240, %v255_v34 }
  0x3d   : > { %215 = vadd.xlane.f32.xlu1 %v214_v11  ;;  %655 = vmatprep.subr.mxu0 %v830_v24  ;;  %v238_v32 = vld [vmem:[%s1136_s1] sm:$0xff]  ;;  %v284_v55 = vsub.s32 %v281_v44, %v1034_v35  ;;  %vm388_vm9 = vcmask 1043456   ;;  %vm384_vm10 = vcmask 31744   ;;  %v470_v44 = vsub.s32 0, %v1034_v35  ;;  %s761_s20 = scalar_lea.vmem %s1088_s7, 2048  ;;  %p1147_p12 = scmp.ne.s32.totalorder %s1143_s24, 0 }
  0x3e   : > { %656 = vmatpush3.msra.mxu0 %v244_v26  ;;  %v291_v60 = vsub.s32 %v288_v49, %v1034_v35  ;;  %v383_v34 = vld [vmem:[%s1137_s2] sm:$0xf]  ;;  %p762_p11 = scmp.ne.s32.totalorder %s1088_s7, %s761_s20  ;;  %s832_s22 = smov [#allocation5]  }
  0x3f   : > { %657 = vmatprep.subr.mxu0 %v830_v24  ;;  %673 = vmatpush3.msk.msra.mxu1 %vm388_vm9, %v383_v34  ;;  %s765_s26 = sshll.u32 %s832_s22, 4  ;;  %s766_s26 = int_to_ptr.vmem [resolvable:$false] %s765_s26 }
  0x40   : > { %218 = vadd.xlane.f32.xlu0 %v217_v16  ;;  %658 = vmatpush3.msra.mxu0 %v243_v27  ;;  %p763_p13 = pnand %p762_p11, %p1147_p12  ;;  %s767_s27 = scalar_lea.vmem %s766_s26, 4096 }
  0x41   : > { %221 = vadd.xlane.f32.xlu1 %v220_v17  ;;  %659 = vmatprep.subr.mxu0 %v830_v24  ;;  %v298_v17 = vsub.s32 %v295_v56, %v1034_v35  ;;  %p768_p5 = scmp.lt.s32.totalorder %s1088_s7, %s766_s26  ;;  %p769_p7 = scmp.lt.s32.totalorder %s767_s27, %s761_s20 }
  0x42   : > { %660 = vmatpush3.msra.mxu0 %v242_v28  ;;  %p764_p4 = pneg %p763_p13 }
  0x43   : > { %661 = vmatprep.subr.mxu0 %v830_v24  ;;  %p770_p8 = por %p769_p7, %p768_p5 }
  0x44   : > { %224 = vadd.xlane.f32.xlu0 %v223_v22  ;;  %662 = vmatpush3.msra.mxu0 %v241_v29 }
  0x45   : > { %227 = vadd.xlane.f32.xlu1 %v226_v23  ;;  %663 = vmatprep.subr.mxu0 %v830_v24  ;;  %p771_p10 = pnand %p770_p8, %p764_p4 }
  0x46   : > { %664 = vmatpush3.msra.mxu0 %v240_v30 }
  0x47   : > { %665 = vmatprep.subr.mxu0 %v830_v24 }
  0x48   : > { %666 = vmatpush3.msra.mxu0 %v239_v31 }
  0x49   : > { %667 = vmatprep.subr.mxu0 %v830_v24  ;;  %v305_v24 = vsub.s32 %v302_v61, %v1034_v35 }
  0x4a   : > { %668 = vmatpush3.msra.mxu0 %v238_v32 }
  0xc1   : > { %v207_v37 = vpop.xlane.xlu0 %206 }
  0xc2   : > { %v213_v40 = vpop.xlane.xlu1 %212  ;;  %v230_v42 = vmul.f32 0.00390625, %v207_v37 }
  0xc3   : > { %v232_v46 = vmul.f32 0.00390625, %v213_v40 }
  0xc4   : > { %v259_v53 = vrot.slane %v230_v42, %v258_v41 }
  0xc5   : > { %v210_v47 = vpop.xlane.xlu0 %209  ;;  %v271_v57 = vrot.slane %v232_v46, %v270_v45 }
  0xc6   : > { %v231_v50 = vmul.f32 0.00390625, %v210_v47  ;;  %v216_v51 = vpop.xlane.xlu1 %215 }
  0xc7   : > { %v233_v52 = vmul.f32 0.00390625, %v216_v51 }
  0xc8   : > { %v264_v54 = vrot.slane %v231_v50, %v263_v43 }
  0xc9   : > { %v278_v58 = vrot.slane %v233_v52, %v277_v48  ;;  %v219_v59 = vpop.xlane.xlu0 %218 }
  0xca   : > { %v266_v62 = vsel %vm265_vm1, %v264_v54, %v259_v53  ;;  %v234_v63 = vmul.f32 0.00390625, %v219_v59  ;;  %v222_v3 = vpop.xlane.xlu1 %221 }
  0xcb   : > { %v273_v7 = vsel %vm272_vm2, %v271_v57, %v266_v62  ;;  %v235_v10 = vmul.f32 0.00390625, %v222_v3 }
  0xcc   : > { %v280_v11 = vsel %vm279_vm3, %v278_v58, %v273_v7  ;;  %v285_v16 = vrot.slane %v234_v63, %v284_v55 }
  0xcd   : > { %v292_v22 = vrot.slane %v235_v10, %v291_v60  ;;  %v225_v23 = vpop.xlane.xlu0 %224 }
  0xce   : > { %v287_v25 = vsel %vm286_vm4, %v285_v16, %v280_v11  ;;  %v236_v26 = vmul.f32 0.00390625, %v225_v23  ;;  %v228_v27 = vpop.xlane.xlu1 %227 }
  0xcf   : > { %v237_v28 = vmul.f32 0.00390625, %v228_v27  ;;  %v294_v30 = vsel %vm293_vm5, %v292_v22, %v287_v25 }
  0xd0   : > { %v299_v29 = vrot.slane %v236_v26, %v298_v17 }
  0xd1   : > { %v306_v31 = vrot.slane %v237_v28, %v305_v24 }
  0xd2   : > { %v301_v32 = vsel %vm300_vm6, %v299_v29, %v294_v30 }
  0xd3   : > { %v308_v33 = vsel %vm307_vm7, %v306_v31, %v301_v32 }
  0xd4   : > { %670 = vmatmul.mubr.msk.f32.vlgmr.msra.gmra.mxu0 %vm309_vm8, %v308_v33 }
 0x194   : > { %v378_v36 = vpop.f32.mrf.mxu0 }
 0x195   : > { %v382_v37 = vmax.f32 %v378_v36, 0.0 }
 0x196   : > { %v671_v38 = vpop.f32.mrf.mxu0 }
 0x197   : > { %675 = vmatmul.mubr.msk.f32.vlgmr.msra.gmra.mxu1 %vm384_vm10, %v382_v37 }
 0x257   : > { %v458_v39 = vpop.f32.mrf.mxu1 }
 0x258   : > { %v634_v40 = vmul.f32 -1.442695, %v458_v39 }
 0x259   : > { %v676_v41 = vpop.f32.mrf.mxu1 }
 0x25a   : > { %729 = vpow2.f32 %v634_v40 }
 0x267   : > { %v730_v42 = vpop.eup %729 }
 0x268   : > { %v465_v43 = vadd.f32 1.0, %v730_v42 }
 0x26a   : > { %731 = vrcp.f32 %v465_v43 }
 0x277   : > { %v732_v45 = vpop.eup %731 }
 0x278   : > { %v471_v46 = vrot.slane %v732_v45, %v470_v44 }
 0x27a   : > { %477 = vbcast.lane.b32.xlu1 %v471_v46, 264  ;;  %473 = vbcast.lane.b32.xlu0 %v471_v46, 256 }
 0x27e   : > { %481 = vbcast.lane.b32.xlu1 %v471_v46, 272  ;;  %489 = vbcast.lane.b32.xlu0 %v471_v46, 288 }
 0x282   : > { %485 = vbcast.lane.b32.xlu1 %v471_v46, 280  ;;  %497 = vbcast.lane.b32.xlu0 %v471_v46, 304 }
 0x286   : > { %493 = vbcast.lane.b32.xlu1 %v471_v46, 296 }
 0x28a   : > { %501 = vbcast.lane.b32.xlu1 %v471_v46, 312 }
 0x2ec   : > { %v478_v47 = vpop.permute.xlu1 %477  ;;  %v474_v48 = vpop.permute.xlu0 %473 }
 0x2ed   : > { %v505_v49 = vmul.f32 %v478_v47, %v972_v5  ;;  %v506_v50 = vmul.f32 %v478_v47, %v974_v6  ;;  %v503_v51 = vmul.f32 %v474_v48, %v962_v0  ;;  %v504_v35 = vmul.f32 %v474_v48, %v964_v1 }
 0x2ef   : > { %521 = vst [vmem:[%s1055_s6 + $0x10] sm:$0xff] %v505_v49  ;;  %522 = vst [vmem:[%s1055_s6 + $0x18] sm:$0xff] %v506_v50 }
 0x2f0   : > { %519 = vst [vmem:[%s1055_s6] sm:$0xff] %v503_v51  ;;  %520 = vst [vmem:[%s1055_s6 + $0x8] sm:$0xff] %v504_v35  ;;  %v482_v5 = vpop.permute.xlu1 %481  ;;  %v490_v0 = vpop.permute.xlu0 %489 }
 0x2f1   : > { %v507_v1 = vmul.f32 %v482_v5, %v966_v2  ;;  %v508_v6 = vmul.f32 %v482_v5, %v970_v4  ;;  %v511_v52 = vmul.f32 %v490_v0, %v986_v12  ;;  %v512_v53 = vmul.f32 %v490_v0, %v988_v13 }
 0x2f3   : > { %523 = vst [vmem:[%s1055_s6 + $0x20] sm:$0xff] %v507_v1  ;;  %524 = vst [vmem:[%s1055_s6 + $0x28] sm:$0xff] %v508_v6 }
 0x2f4   : > { %527 = vst [vmem:[%s1055_s6 + $0x40] sm:$0xff] %v511_v52  ;;  %528 = vst [vmem:[%s1055_s6 + $0x48] sm:$0xff] %v512_v53  ;;  %v486_v54 = vpop.permute.xlu1 %485  ;;  %v498_v55 = vpop.permute.xlu0 %497 }
 0x2f5   : > { %v509_v2 = vmul.f32 %v486_v54, %v978_v8  ;;  %v510_v56 = vmul.f32 %v486_v54, %v980_v9  ;;  %v515_v4 = vmul.f32 %v498_v55, %v998_v18  ;;  %v516_v12 = vmul.f32 %v498_v55, %v1000_v19 }
 0x2f7   : > { %525 = vst [vmem:[%s1055_s6 + $0x30] sm:$0xff] %v509_v2  ;;  %526 = vst [vmem:[%s1055_s6 + $0x38] sm:$0xff] %v510_v56 }
 0x2f8   : > { %531 = vst [vmem:[%s1055_s6 + $0x60] sm:$0xff] %v515_v4  ;;  %532 = vst [vmem:[%s1055_s6 + $0x68] sm:$0xff] %v516_v12  ;;  %v494_v13 = vpop.permute.xlu1 %493 }
 0x2f9   : > { %v513_v57 = vmul.f32 %v494_v13, %v990_v14  ;;  %v514_v58 = vmul.f32 %v494_v13, %v992_v15 }
 0x2fb   : > { %529 = vst [vmem:[%s1055_s6 + $0x50] sm:$0xff] %v513_v57  ;;  %530 = vst [vmem:[%s1055_s6 + $0x58] sm:$0xff] %v514_v58 }
 0x2fc   : > { %v502_v8 = vpop.permute.xlu1 %501 }
 0x2fd   : > { %v517_v9 = vmul.f32 %v502_v8, %v1002_v20  ;;  %v518_v14 = vmul.f32 %v502_v8, %v1004_v21 }
 0x2ff   : > { %533 = vst [vmem:[%s1055_s6 + $0x70] sm:$0xff] %v517_v9  ;;  %534 = vst [vmem:[%s1055_s6 + $0x78] sm:$0xff] %v518_v14 }
 0x300   : > { %774 = shalt.err (!%p771_p10)
}
 0x301   : > { %s775_s28 = scalar_lea.hbm %s1086_s19, 2048  ;;  %s779_s10 = scalar_lea.hbm %s1138_s3, 4096 }
 0x302   : > { %p776_p0 = scmp.ne.s32.totalorder %s1086_s19, %s775_s28  ;;  %p780_p1 = scmp.lt.s32.totalorder %s1086_s19, %s1138_s3 }
 0x303   : > { %p781_p3 = scmp.lt.s32.totalorder %s779_s10, %s775_s28 }
 0x304   : > { %p777_p2 = pnand %p776_p0, %p1147_p12 }
 0x305   : > { %p782_p6 = por %p781_p3, %p780_p1 }
 0x306   : > { %p778_p9 = pneg %p777_p2 }
 0x308   : > { %p783_p11 = pnand %p782_p6, %p778_p9 }
 0x30a   : > { %786 = shalt.err (!%p783_p11)
}
 0x30b   : > { %s833_s4 = smov 256   ;;  %s834_s6 = smov 16  }
 0x30c   : > { %679 = dma.vmem_to_hbm [thread:$0]  (%p1147_p12), %s1088_s7, 2048, %s1086_s19, %s536_s16, %s833_s4, %s833_s4, %s834_s6  }
 0x30d PF: > { %s564_s9 = sand.u32 1, %s813_s12   ;;  %p1148_p13 = scmp.ne.s32.totalorder %s1144_s25, 0 }
 0x30e   : > { %p1149_p4 = scmp.ge.s32.totalorder %s825_s15, 2  ;;  %s565_s8 = scalar_lea.sflag [#allocation4], %s564_s9 }
 0x310   : > { %p686_p5 = pnand %p1149_p4, %p1148_p13 }
 0x312   : > { %p687_p7 = pneg %p686_p5 }
 0x314   : > { %808 = dma.done.wait (%p687_p7), %s565_s8, 2048  }
 0x315   : > { %810 = vsyncadd (%p687_p7), %s565_s8, 4294965248  ;;  %p16_p8 = scmp.ge.s32.totalorder %s880_s18, 4   ;;  %s1150_s12 = smov %s817_s13 }
 0x316   : > { %s1151_s13 = smov %s821_s14  ;;  %s1152_s14 = smov %s892_s21 }
 0x317   : > { %s1153_s15 = smov %s880_s18  ;;  %18 = sbr.rel (!%p16_p8) target bundleno = 5 (0x5), region = 77 }
 0x31c   :  { %570 = vsyncpa [#allocation3], 1 }
 0x31d   :  { %572 = vsyncpa [#allocation3 + $0x1], 1 }
 0x31e   :  { %573 = vsyncpa [#allocation4], 1 }
 0x31f   :  { %575 = vsyncpa [#allocation4 + $0x1], 1 }

</bundles_post_ra>
